<compile_context>
chip_gen: v6e
topology: v6e:2x2x1
jax: 0.10.0
libtpu: 0.0.40
codegen_flags: <defaults>
</compile_context>

<pallas_src>
import functools

import jax
import jax.numpy as jnp
from jax.experimental import pallas as pl
from jax.experimental.pallas import tpu as pltpu

LAMBDA1, LAMBDA2, LAMBDA3, LAMBDA4 = 1.0, 0.5, 0.3, 0.3
MARGIN = 0.3
COS_EPS = 1e-8
LANES = 128
MAX_TILE_ROWS = 512      # 512x128 f32 tile = 256 KiB; x2 buffers x3 streams ~ 1.5 MiB
NUM_ROW_SHARDS = 2       # v7x has 2 TensorCores; on 1-TC chips this is a cheap outer loop


def _total_loss_kernel(logits_ref, labels_ref, w_ref,
                       img_ref, txt_ref, neu_ref,
                       recon_ref, target_ref, attn_ref,
                       out_ref,
                       recon_acc_ref, attn_acc_ref,
                       *, nb_per_shard, tr_recon, rows_recon, tr_attn, rows_attn):
    p = pl.program_id(0)              # row shard ("parallel")
    j = pl.program_id(1)              # reduction step within the shard ("arbitrary")
    g = p * nb_per_shard + j          # global block index

    @pl.when(j == 0)
    def _init():
        recon_acc_ref[...] = jnp.zeros_like(recon_acc_ref)
        attn_acc_ref[...] = jnp.zeros_like(attn_acc_ref)

    # ---------------- streamed reductions: masked lane-wise partial sums ----------------
    # Row mask handles (a) the ragged final tile, (b) shards whose global block index runs
    # past this tensor's block count (their garbage padding is never accumulated).
    def _masked_sq_sum_rows(x2, tile_rows, total_rows):
        ridx = g * tile_rows + jax.lax.broadcasted_iota(jnp.int32, x2.shape, 0)
        return jnp.sum(jnp.where(ridx < total_rows, x2, 0.0), axis=0, keepdims=True)

    diff = recon_ref[...].astype(jnp.float32) - target_ref[...].astype(jnp.float32)
    recon_acc_ref[...] += _masked_sq_sum_rows(diff * diff, tr_recon, rows_recon)

    a = attn_ref[...].astype(jnp.float32)
    attn_acc_ref[...] += _masked_sq_sum_rows(a * a, tr_attn, rows_attn)

    # ---------------- finalize: pack this shard's partials (rows 0..3 of the block) ------
    def _pack(ce, con, r_ss, a_ss):
        row = jax.lax.broadcasted_iota(jnp.int32, out_ref.shape, 0)
        zeros = jnp.zeros(out_ref.shape, jnp.float32)
        return jnp.where(row == 0, ce,
               jnp.where(row == 1, con,
               jnp.where(row == 2, r_ss,
               jnp.where(row == 3, a_ss, zeros))))

    last = j == nb_per_shard - 1

    @pl.when(last)
    def _finalize():
        zero = jnp.zeros((1, 1), jnp.float32)
        r_ss = jnp.sum(recon_acc_ref[...], keepdims=True)
        a_ss = jnp.sum(attn_acc_ref[...], keepdims=True)
        out_ref[...] = _pack(zero, zero, r_ss, a_ss)

    @pl.when(jnp.logical_and(last, p == 0))
    def _finalize_small_terms():
        # -------- weighted cross entropy (no full log_softmax, no f32 one-hot) --------
        logits = logits_ref[...].astype(jnp.float32)       # (N, C)
        labels = labels_ref[...]                            # (N, 1) int32
        w = w_ref[...].astype(jnp.float32)                  # (1, C)
        n, c = logits.shape
        hit = jax.lax.broadcasted_iota(jnp.int32, (n, c), 1) == labels
        m = jnp.max(logits, axis=1, keepdims=True)
        lse = m + jnp.log(jnp.sum(jnp.exp(logits - m), axis=1, keepdims=True))
        logit_at_label = jnp.sum(jnp.where(hit, logits, 0.0), axis=1, keepdims=True)
        # NOTE: an out-of-range label silently gets weight 0 here (PyTorch would raise).
        wi = jnp.sum(jnp.where(hit, w, 0.0), axis=1, keepdims=True)
        nll = lse - logit_at_label
        ce = jnp.sum(wi * nll, keepdims=True) / jnp.sum(wi, keepdims=True)   # (1, 1)

        # -------- self contrastive (cosine, shared img norm, rsqrt on EUP) --------
        # TODO(synk): at production N with D < 128, pack img/txt/neu into one lane-dense
        # (N, 3*D) input to avoid 75%-masked vregs and 3 separate DMAs.
        img = img_ref[...].astype(jnp.float32)
        txt = txt_ref[...].astype(jnp.float32)
        neu = neu_ref[...].astype(jnp.float32)
        eps2 = COS_EPS * COS_EPS
        inv_i = jax.lax.rsqrt(jnp.maximum(jnp.sum(img * img, axis=1, keepdims=True), eps2))
        inv_t = jax.lax.rsqrt(jnp.maximum(jnp.sum(txt * txt, axis=1, keepdims=True), eps2))
        inv_n = jax.lax.rsqrt(jnp.maximum(jnp.sum(neu * neu, axis=1, keepdims=True), eps2))
        pos = jnp.sum(img * txt, axis=1, keepdims=True) * inv_i * inv_t
        neg = jnp.sum(img * neu, axis=1, keepdims=True) * inv_i * inv_n
        con = jnp.mean(jnp.maximum(MARGIN + neg - pos, 0.0), keepdims=True)  # (1, 1)

        r_ss = jnp.sum(recon_acc_ref[...], keepdims=True)
        a_ss = jnp.sum(attn_acc_ref[...], keepdims=True)
        out_ref[...] = _pack(ce, con, r_ss, a_ss)


def _to_lane_dense(x, lanes=LANES):
    """Flatten to (-1, lanes). Copy-free when numel % lanes == 0 (no extra HBM pass)."""
    flat = x.reshape(-1)
    n = flat.shape[0]
    if n % lanes:
        # TODO(synk): replace this pad (extra HBM read+write pass) with an in-kernel lane
        # mask on the ragged tail for production shapes whose numel % 128 != 0.
        flat = jnp.pad(flat, (0, (-n) % lanes))
    return flat.reshape(-1, lanes), n


def total_loss(logits, labels, weights, image_embeds, text_embeds, neutral_embeds,
               recon_img, target_img, attention_map, *, stream_dtype=None):
    N, C = logits.shape
    labels2d = labels.reshape(N, 1).astype(jnp.int32)
    w2d = weights.reshape(1, C).astype(jnp.float32)

    recon2d, recon_count = _to_lane_dense(recon_img)
    target2d, _ = _to_lane_dense(target_img)
    attn2d, _ = _to_lane_dense(attention_map)

    if stream_dtype is not None:
        # Optional bf16-on-the-wire for the HBM-dominant tensors (halves HBM bytes);
        # all accumulation stays f32 in-kernel. Default off to keep exact f32 semantics.
        recon2d = recon2d.astype(stream_dtype)
        target2d = target2d.astype(stream_dtype)
        attn2d = attn2d.astype(stream_dtype)

    rows_recon = recon2d.shape[0]
    rows_attn = attn2d.shape[0]
    tr_recon = min(MAX_TILE_ROWS, rows_recon)
    tr_attn = min(MAX_TILE_ROWS, rows_attn)
    nb_recon = pl.cdiv(rows_recon, tr_recon)
    nb_attn = pl.cdiv(rows_attn, tr_attn)
    nb_total = max(nb_recon, nb_attn)
    shards = NUM_ROW_SHARDS
    nb_per_shard = pl.cdiv(nb_total, shards)
    grid = (shards, nb_per_shard)

    def const_spec(shape):
        return pl.BlockSpec(shape, lambda p, j: (0, 0))

    def stream_spec(tr, nb):
        # Clamp so trailing shard iterations replay the last valid block; the in-kernel
        # row mask drops their contribution, so no OOB DMA and no double counting.
        return pl.BlockSpec(
            (tr, LANES),
            lambda p, j, _nb=nb: (jnp.minimum(p * nb_per_shard + j, _nb - 1), 0))

    in_specs = [
        const_spec((N, C)),                    # logits
        const_spec((N, 1)),                    # labels
        const_spec((1, C)),                    # class weights
        const_spec(image_embeds.shape),        # image embeds
        const_spec(text_embeds.shape),         # text embeds
        const_spec(neutral_embeds.shape),      # neutral embeds
        stream_spec(tr_recon, nb_recon),       # recon (lane-dense)
        stream_spec(tr_recon, nb_recon),       # target (lane-dense)
        stream_spec(tr_attn, nb_attn),         # attention (lane-dense)
    ]
    out_specs = pl.BlockSpec((8, LANES), lambda p, j: (p, 0))
    out_shape = jax.ShapeDtypeStruct((shards * 8, LANES), jnp.float32)
    scratch_shapes = [pltpu.VMEM((1, LANES), jnp.float32),   # recon sum-of-squares (lane-wise)
                      pltpu.VMEM((1, LANES), jnp.float32)]   # attn  sum-of-squares (lane-wise)

    # Explicit VMEM budget (double-buffered streamed tiles + resident small blocks + slack);
    # sized to fit v7x's 64 MiB physical VMEM as well as v5e's smaller scoped default.
    stream_item = recon2d.dtype.itemsize
    streamed_bytes = 2 * LANES * stream_item * (2 * tr_recon + tr_attn)
    small_bytes = sum(int(x.size) * x.dtype.itemsize for x in
                      (logits, labels2d, w2d, image_embeds, text_embeds, neutral_embeds))
    vmem_limit = int(min(64 << 20, max(8 << 20, 2 * (streamed_bytes + small_bytes) + (2 << 20))))

    D = image_embeds.shape[1]
    in_bytes = sum(int(x.size) * x.dtype.itemsize for x in
                   (logits, labels2d, w2d, image_embeds, text_embeds, neutral_embeds,
                    recon2d, target2d, attn2d))
    cost = pl.CostEstimate(
        flops=int(3 * (recon2d.size + target2d.size) + 2 * attn2d.size + 8 * N * C + 10 * N * D),
        transcendentals=int(N * C + 4 * N),
        bytes_accessed=int(in_bytes + shards * 8 * LANES * 4),
    )

    kernel = functools.partial(
        _total_loss_kernel,
        nb_per_shard=nb_per_shard,
        tr_recon=tr_recon, rows_recon=rows_recon,
        tr_attn=tr_attn, rows_attn=rows_attn)

    parts = pl.pallas_call(
        kernel,
        grid=grid,
        in_specs=in_specs,
        out_specs=out_specs,
        out_shape=out_shape,
        scratch_shapes=scratch_shapes,
        compiler_params=pltpu.CompilerParams(
            dimension_semantics=("parallel", "arbitrary"),
            vmem_limit_bytes=vmem_limit),
        cost_estimate=cost,
    )(logits, labels2d, w2d, image_embeds, text_embeds, neutral_embeds,
      recon2d, target2d, attn2d)

    # Combine per-shard partials (tiny scalar math; cheaper than cross-core comms in-kernel).
    parts = parts.reshape(shards, 8, LANES)
    ce = parts[0, 0, 0]
    con = parts[0, 1, 0]
    recon_ss = jnp.sum(parts[:, 2, 0])
    attn_ss = jnp.sum(parts[:, 3, 0])
    return (LAMBDA1 * ce + LAMBDA2 * con
            + LAMBDA3 * recon_ss / jnp.float32(recon_count)
            + LAMBDA4 * jnp.sqrt(attn_ss))


def _reference(logits, labels, weights, img, txt, neu, recon, target, attn):
    # pure-JAX reference mirroring the PyTorch module
    logp = jax.nn.log_softmax(logits.astype(jnp.float32), axis=1)
    nll = -jnp.take_along_axis(logp, labels[:, None], axis=1)[:, 0]
    wi = weights[labels]
    ce = jnp.sum(wi * nll) / jnp.sum(wi)

    def cos(a, b):
        na = jnp.maximum(jnp.linalg.norm(a, axis=1), COS_EPS)
        nb = jnp.maximum(jnp.linalg.norm(b, axis=1), COS_EPS)
        return jnp.sum(a * b, axis=1) / (na * nb)

    contrast = jnp.mean(jax.nn.relu(MARGIN + cos(img, neu) - cos(img, txt)))
    recon_l = jnp.mean((recon - target) ** 2)
    attn_l = jnp.sqrt(jnp.sum(attn ** 2))
    return LAMBDA1 * ce + LAMBDA2 * contrast + LAMBDA3 * recon_l + LAMBDA4 * attn_l


if __name__ == "__main__":
    key = jax.random.PRNGKey(0)
    ks = jax.random.split(key, 9)

    N, C, D = 8, 8, 32
    logits = jax.random.normal(ks[0], (N, C), jnp.float32)
    labels = jax.random.randint(ks[1], (N,), 0, C, jnp.int32)
    weights = jnp.linspace(0.5, 1.5, C, dtype=jnp.float32)       # deterministic class weights

    image_embeds = jax.random.normal(ks[2], (N, D), jnp.float32)
    text_embeds = jax.random.normal(ks[3], (N, D), jnp.float32)
    neutral_embeds = jax.random.normal(ks[4], (N, D), jnp.float32)

    recon_img = jax.random.normal(ks[5], (2, 4, 16, 16), jnp.float32)    # NCHW
    target_img = jax.random.normal(ks[6], (2, 4, 16, 16), jnp.float32)   # NCHW
    attention_map = jax.random.normal(ks[7], (2, 4, 8, 8), jnp.float32)

    out = total_loss(logits, labels, weights, image_embeds, text_embeds,
                     neutral_embeds, recon_img, target_img, attention_map)
    out = jax.block_until_ready(out)

    ref = _reference(logits, labels, weights, image_embeds, text_embeds,
                     neutral_embeds, recon_img, target_img, attention_map)
    assert jnp.allclose(out, ref, rtol=1e-5, atol=1e-5), (out, ref)
    print("KERNEL_OK")
</pallas_src>

<mosaic_0001>
module attributes {stable_mosaic.version = 11 : i64} {
  func.func @_total_loss_kernel(%arg0: i32, %arg1: i32, %arg2: memref<8x8xf32, #tpu.memory_space<vmem>>, %arg3: memref<8x1xi32, #tpu.memory_space<vmem>>, %arg4: memref<1x8xf32, #tpu.memory_space<vmem>>, %arg5: memref<8x32xf32, #tpu.memory_space<vmem>>, %arg6: memref<8x32xf32, #tpu.memory_space<vmem>>, %arg7: memref<8x32xf32, #tpu.memory_space<vmem>>, %arg8: memref<16x128xf32, #tpu.memory_space<vmem>>, %arg9: memref<16x128xf32, #tpu.memory_space<vmem>>, %arg10: memref<4x128xf32, #tpu.memory_space<vmem>>, %arg11: memref<8x128xf32, #tpu.memory_space<vmem>>, %arg12: memref<1x128xf32, #tpu.memory_space<vmem>>, %arg13: memref<1x128xf32, #tpu.memory_space<vmem>>) attributes {dimension_semantics = [#tpu.dimension_semantics<parallel>, #tpu.dimension_semantics<arbitrary>], iteration_bounds = array<i64: 2, 1>, scalar_prefetch = 0 : i64, scratch_operands = 2 : i64, tpu.core_type = #tpu.core_type<tc>, window_params = [{pipeline_mode = #tpu.pipeline_mode<synchronous>, transform_indices = @transform_0, window_bounds = array<i64: 8, 8>}, {pipeline_mode = #tpu.pipeline_mode<synchronous>, transform_indices = @transform_1, window_bounds = array<i64: 8, 1>}, {pipeline_mode = #tpu.pipeline_mode<synchronous>, transform_indices = @transform_2, window_bounds = array<i64: 1, 8>}, {pipeline_mode = #tpu.pipeline_mode<synchronous>, transform_indices = @transform_3, window_bounds = array<i64: 8, 32>}, {pipeline_mode = #tpu.pipeline_mode<synchronous>, transform_indices = @transform_4, window_bounds = array<i64: 8, 32>}, {pipeline_mode = #tpu.pipeline_mode<synchronous>, transform_indices = @transform_5, window_bounds = array<i64: 8, 32>}, {transform_indices = @transform_6, window_bounds = array<i64: 16, 128>}, {transform_indices = @transform_7, window_bounds = array<i64: 16, 128>}, {transform_indices = @transform_8, window_bounds = array<i64: 4, 128>}, {transform_indices = @transform_9, window_bounds = array<i64: 8, 128>}]} {
    %c1_i32 = arith.constant 1 : i32
    %0 = arith.muli %arg0, %c1_i32 : i32
    %1 = arith.addi %0, %arg1 : i32
    %c0_i32 = arith.constant 0 : i32
    %2 = arith.cmpi eq, %arg1, %c0_i32 : i32
    %3 = arith.extui %2 : i1 to i32
    %c0_i32_0 = arith.constant 0 : i32
    %4 = arith.cmpi ne, %3, %c0_i32_0 : i32
    scf.if %4 {
      %cst_23 = arith.constant 0.000000e+00 : f32
      %44 = vector.broadcast %cst_23 : f32 to vector<1x128xf32>
      %c0_24 = arith.constant 0 : index
      %c0_25 = arith.constant 0 : index
      %45 = vector.load %arg12[%c0_24, %c0_25] : memref<1x128xf32, #tpu.memory_space<vmem>>, vector<1x128xf32>
      tpu.vector_store %arg12[%c0_24, %c0_25], %44 {strides = array<i32>} : memref<1x128xf32, #tpu.memory_space<vmem>>, vector<1x128xf32>,
      %cst_26 = arith.constant 0.000000e+00 : f32
      %46 = vector.broadcast %cst_26 : f32 to vector<1x128xf32>
      %c0_27 = arith.constant 0 : index
      %c0_28 = arith.constant 0 : index
      %47 = vector.load %arg13[%c0_27, %c0_28] : memref<1x128xf32, #tpu.memory_space<vmem>>, vector<1x128xf32>
      tpu.vector_store %arg13[%c0_27, %c0_28], %46 {strides = array<i32>} : memref<1x128xf32, #tpu.memory_space<vmem>>, vector<1x128xf32>,
    } else {
    }
    %c0 = arith.constant 0 : index
    %c0_1 = arith.constant 0 : index
    %5 = vector.load %arg8[%c0, %c0_1] : memref<16x128xf32, #tpu.memory_space<vmem>>, vector<16x128xf32>
    %c0_2 = arith.constant 0 : index
    %c0_3 = arith.constant 0 : index
    %6 = vector.load %arg9[%c0_2, %c0_3] : memref<16x128xf32, #tpu.memory_space<vmem>>, vector<16x128xf32>
    %7 = arith.subf %5, %6 : vector<16x128xf32>
    %c0_4 = arith.constant 0 : index
    %c0_5 = arith.constant 0 : index
    %8 = vector.load %arg12[%c0_4, %c0_5] : memref<1x128xf32, #tpu.memory_space<vmem>>, vector<1x128xf32>
    %9 = arith.mulf %7, %7 : vector<16x128xf32>
    %c16_i32 = arith.constant 16 : i32
    %10 = arith.muli %1, %c16_i32 : i32
    %11 = tpu.iota {dimensions = array<i32: 0>} : vector<16x128xi32>
    %12 = vector.broadcast %10 : i32 to vector<16x128xi32>
    %13 = arith.addi %12, %11 : vector<16x128xi32>
    %c16_i32_6 = arith.constant 16 : i32
    %14 = vector.broadcast %c16_i32_6 : i32 to vector<16x128xi32>
    %15 = arith.cmpi slt, %13, %14 : vector<16x128xi32>
    %cst = arith.constant 0.000000e+00 : f32
    %16 = vector.broadcast %cst : f32 to vector<16x128xf32>
    %17 = arith.select %15, %9, %16 : vector<16x128xi1>, vector<16x128xf32>
    %cst_7 = arith.constant dense<0.000000e+00> : vector<128xf32>
    %18 = vector.multi_reduction <add>, %17, %cst_7 [0] : vector<16x128xf32> to vector<128xf32>
    %19 = vector.shape_cast %18 : vector<128xf32> to vector<1x128xf32>
    %20 = arith.addf %8, %19 : vector<1x128xf32>
    %c0_8 = arith.constant 0 : index
    %c0_9 = arith.constant 0 : index
    %21 = vector.load %arg12[%c0_8, %c0_9] : memref<1x128xf32, #tpu.memory_space<vmem>>, vector<1x128xf32>
    tpu.vector_store %arg12[%c0_8, %c0_9], %20 {strides = array<i32>} : memref<1x128xf32, #tpu.memory_space<vmem>>, vector<1x128xf32>,
    %c0_10 = arith.constant 0 : index
    %c0_11 = arith.constant 0 : index
    %22 = vector.load %arg10[%c0_10, %c0_11] : memref<4x128xf32, #tpu.memory_space<vmem>>, vector<4x128xf32>
    %c0_12 = arith.constant 0 : index
    %c0_13 = arith.constant 0 : index
    %23 = vector.load %arg13[%c0_12, %c0_13] : memref<1x128xf32, #tpu.memory_space<vmem>>, vector<1x128xf32>
    %24 = arith.mulf %22, %22 : vector<4x128xf32>
    %c4_i32 = arith.constant 4 : i32
    %25 = arith.muli %1, %c4_i32 : i32
    %26 = tpu.iota {dimensions = array<i32: 0>} : vector<4x128xi32>
    %27 = vector.broadcast %25 : i32 to vector<4x128xi32>
    %28 = arith.addi %27, %26 : vector<4x128xi32>
    %c4_i32_14 = arith.constant 4 : i32
    %29 = vector.broadcast %c4_i32_14 : i32 to vector<4x128xi32>
    %30 = arith.cmpi slt, %28, %29 : vector<4x128xi32>
    %cst_15 = arith.constant 0.000000e+00 : f32
    %31 = vector.broadcast %cst_15 : f32 to vector<4x128xf32>
    %32 = arith.select %30, %24, %31 : vector<4x128xi1>, vector<4x128xf32>
    %cst_16 = arith.constant dense<0.000000e+00> : vector<128xf32>
    %33 = vector.multi_reduction <add>, %32, %cst_16 [0] : vector<4x128xf32> to vector<128xf32>
    %34 = vector.shape_cast %33 : vector<128xf32> to vector<1x128xf32>
    %35 = arith.addf %23, %34 : vector<1x128xf32>
    %c0_17 = arith.constant 0 : index
    %c0_18 = arith.constant 0 : index
    %36 = vector.load %arg13[%c0_17, %c0_18] : memref<1x128xf32, #tpu.memory_space<vmem>>, vector<1x128xf32>
    tpu.vector_store %arg13[%c0_17, %c0_18], %35 {strides = array<i32>} : memref<1x128xf32, #tpu.memory_space<vmem>>, vector<1x128xf32>,
    %c0_i32_19 = arith.constant 0 : i32
    %37 = arith.cmpi eq, %arg1, %c0_i32_19 : i32
    %38 = arith.extui %37 : i1 to i32
    %c0_i32_20 = arith.constant 0 : i32
    %39 = arith.cmpi ne, %38, %c0_i32_20 : i32
    scf.if %39 {
      %cst_23 = arith.constant 0.000000e+00 : f32
      %44 = vector.broadcast %cst_23 : f32 to vector<1x1xf32>
      %c0_24 = arith.constant 0 : index
      %c0_25 = arith.constant 0 : index
      %45 = vector.load %arg12[%c0_24, %c0_25] : memref<1x128xf32, #tpu.memory_space<vmem>>, vector<1x128xf32>
      %46 = vector.shape_cast %45 : vector<1x128xf32> to vector<1x1x128xf32>
      %cst_26 = arith.constant dense<0.000000e+00> : vector<1xf32>
      %47 = vector.multi_reduction <add>, %46, %cst_26 [1, 2] : vector<1x1x128xf32> to vector<1xf32>
      %48 = vector.shape_cast %47 : vector<1xf32> to vector<1x1x1xf32>
      %49 = vector.extract %48[0, 0, 0] : f32 from vector<1x1x1xf32>
      %50 = vector.broadcast %49 : f32 to vector<1x1xf32>
      %c0_27 = arith.constant 0 : index
      %c0_28 = arith.constant 0 : index
      %51 = vector.load %arg13[%c0_27, %c0_28] : memref<1x128xf32, #tpu.memory_space<vmem>>, vector<1x128xf32>
      %52 = vector.shape_cast %51 : vector<1x128xf32> to vector<1x1x128xf32>
      %cst_29 = arith.constant dense<0.000000e+00> : vector<1xf32>
      %53 = vector.multi_reduction <add>, %52, %cst_29 [1, 2] : vector<1x1x128xf32> to vector<1xf32>
      %54 = vector.shape_cast %53 : vector<1xf32> to vector<1x1x1xf32>
      %55 = vector.extract %54[0, 0, 0] : f32 from vector<1x1x1xf32>
      %56 = vector.broadcast %55 : f32 to vector<1x1xf32>
      %57 = tpu.iota {dimensions = array<i32: 0>} : vector<8x128xi32>
      %cst_30 = arith.constant 0.000000e+00 : f32
      %58 = vector.broadcast %cst_30 : f32 to vector<8x128xf32>
      %c0_i32_31 = arith.constant 0 : i32
      %59 = vector.broadcast %c0_i32_31 : i32 to vector<8x128xi32>
      %60 = arith.cmpi eq, %57, %59 : vector<8x128xi32>
      %c1_i32_32 = arith.constant 1 : i32
      %61 = vector.broadcast %c1_i32_32 : i32 to vector<8x128xi32>
      %62 = arith.cmpi eq, %57, %61 : vector<8x128xi32>
      %c2_i32 = arith.constant 2 : i32
      %63 = vector.broadcast %c2_i32 : i32 to vector<8x128xi32>
      %64 = arith.cmpi eq, %57, %63 : vector<8x128xi32>
      %c3_i32 = arith.constant 3 : i32
      %65 = vector.broadcast %c3_i32 : i32 to vector<8x128xi32>
      %66 = arith.cmpi eq, %57, %65 : vector<8x128xi32>
      %67 = vector.shape_cast %56 : vector<1x1xf32> to vector<1x1xf32>
      %68 = vector.broadcast %67 : vector<1x1xf32> to vector<8x128xf32>
      %69 = arith.select %66, %68, %58 : vector<8x128xi1>, vector<8x128xf32>
      %70 = vector.shape_cast %50 : vector<1x1xf32> to vector<1x1xf32>
      %71 = vector.broadcast %70 : vector<1x1xf32> to vector<8x128xf32>
      %72 = arith.select %64, %71, %69 : vector<8x128xi1>, vector<8x128xf32>
      %73 = vector.shape_cast %44 : vector<1x1xf32> to vector<1x1xf32>
      %74 = vector.broadcast %73 : vector<1x1xf32> to vector<8x128xf32>
      %75 = arith.select %62, %74, %72 : vector<8x128xi1>, vector<8x128xf32>
      %76 = vector.shape_cast %44 : vector<1x1xf32> to vector<1x1xf32>
      %77 = vector.broadcast %76 : vector<1x1xf32> to vector<8x128xf32>
      %78 = arith.select %60, %77, %75 : vector<8x128xi1>, vector<8x128xf32>
      %c0_33 = arith.constant 0 : index
      %c0_34 = arith.constant 0 : index
      %79 = vector.load %arg11[%c0_33, %c0_34] : memref<8x128xf32, #tpu.memory_space<vmem>>, vector<8x128xf32>
      tpu.vector_store %arg11[%c0_33, %c0_34], %78 {strides = array<i32>} : memref<8x128xf32, #tpu.memory_space<vmem>>, vector<8x128xf32>,
    } else {
    }
    %c0_i32_21 = arith.constant 0 : i32
    %40 = arith.cmpi eq, %arg0, %c0_i32_21 : i32
    %41 = arith.andi %37, %40 : i1
    %42 = arith.extui %41 : i1 to i32
    %c0_i32_22 = arith.constant 0 : i32
    %43 = arith.cmpi ne, %42, %c0_i32_22 : i32
    scf.if %43 {
      %c0_23 = arith.constant 0 : index
      %c0_24 = arith.constant 0 : index
      %44 = vector.load %arg2[%c0_23, %c0_24] : memref<8x8xf32, #tpu.memory_space<vmem>>, vector<8x8xf32>
      %c0_25 = arith.constant 0 : index
      %c0_26 = arith.constant 0 : index
      %45 = vector.load %arg3[%c0_25, %c0_26] : memref<8x1xi32, #tpu.memory_space<vmem>>, vector<8x1xi32>
      %c0_27 = arith.constant 0 : index
      %c0_28 = arith.constant 0 : index
      %46 = vector.load %arg4[%c0_27, %c0_28] : memref<1x8xf32, #tpu.memory_space<vmem>>, vector<1x8xf32>
      %47 = tpu.iota {dimensions = array<i32: 1>} : vector<8x8xi32>
      %48 = vector.broadcast %45 : vector<8x1xi32> to vector<8x8xi32>
      %49 = arith.cmpi eq, %47, %48 : vector<8x8xi32>
      %cst_29 = arith.constant dense<0xFF800000> : vector<8xf32>
      %50 = vector.multi_reduction <maximumf>, %44, %cst_29 [1] : vector<8x8xf32> to vector<8xf32>
      %51 = vector.shape_cast %50 : vector<8xf32> to vector<8x1xf32>
      %52 = vector.broadcast %51 : vector<8x1xf32> to vector<8x8xf32>
      %53 = arith.subf %44, %52 : vector<8x8xf32>
      %54 = math.exp %53 : vector<8x8xf32>
      %cst_30 = arith.constant dense<0.000000e+00> : vector<8xf32>
      %55 = vector.multi_reduction <add>, %54, %cst_30 [1] : vector<8x8xf32> to vector<8xf32>
      %56 = vector.shape_cast %55 : vector<8xf32> to vector<8x1xf32>
      %57 = math.log %56 : vector<8x1xf32>
      %58 = arith.addf %51, %57 : vector<8x1xf32>
      %cst_31 = arith.constant 0.000000e+00 : f32
      %59 = vector.broadcast %cst_31 : f32 to vector<8x8xf32>
      %60 = arith.select %49, %44, %59 : vector<8x8xi1>, vector<8x8xf32>
      %cst_32 = arith.constant dense<0.000000e+00> : vector<8xf32>
      %61 = vector.multi_reduction <add>, %60, %cst_32 [1] : vector<8x8xf32> to vector<8xf32>
      %62 = vector.shape_cast %61 : vector<8xf32> to vector<8x1xf32>
      %cst_33 = arith.constant 0.000000e+00 : f32
      %63 = vector.shape_cast %46 : vector<1x8xf32> to vector<1x8xf32>
      %64 = vector.broadcast %63 : vector<1x8xf32> to vector<8x8xf32>
      %65 = vector.broadcast %cst_33 : f32 to vector<8x8xf32>
      %66 = arith.select %49, %64, %65 : vector<8x8xi1>, vector<8x8xf32>
      %cst_34 = arith.constant dense<0.000000e+00> : vector<8xf32>
      %67 = vector.multi_reduction <add>, %66, %cst_34 [1] : vector<8x8xf32> to vector<8xf32>
      %68 = vector.shape_cast %67 : vector<8xf32> to vector<8x1xf32>
      %69 = arith.subf %58, %62 : vector<8x1xf32>
      %70 = arith.mulf %68, %69 : vector<8x1xf32>
      %71 = vector.shape_cast %70 : vector<8x1xf32> to vector<1x8x1xf32>
      %cst_35 = arith.constant dense<0.000000e+00> : vector<1xf32>
      %72 = vector.multi_reduction <add>, %71, %cst_35 [1, 2] : vector<1x8x1xf32> to vector<1xf32>
      %73 = vector.shape_cast %72 : vector<1xf32> to vector<1x1x1xf32>
      %74 = vector.extract %73[0, 0, 0] : f32 from vector<1x1x1xf32>
      %75 = vector.broadcast %74 : f32 to vector<1x1xf32>
      %76 = vector.shape_cast %68 : vector<8x1xf32> to vector<1x8x1xf32>
      %cst_36 = arith.constant dense<0.000000e+00> : vector<1xf32>
      %77 = vector.multi_reduction <add>, %76, %cst_36 [1, 2] : vector<1x8x1xf32> to vector<1xf32>
      %78 = vector.shape_cast %77 : vector<1xf32> to vector<1x1x1xf32>
      %79 = vector.extract %78[0, 0, 0] : f32 from vector<1x1x1xf32>
      %80 = vector.broadcast %79 : f32 to vector<1x1xf32>
      %81 = arith.divf %75, %80 : vector<1x1xf32>
      %c0_37 = arith.constant 0 : index
      %c0_38 = arith.constant 0 : index
      %82 = vector.load %arg5[%c0_37, %c0_38] : memref<8x32xf32, #tpu.memory_space<vmem>>, vector<8x32xf32>
      %c0_39 = arith.constant 0 : index
      %c0_40 = arith.constant 0 : index
      %83 = vector.load %arg6[%c0_39, %c0_40] : memref<8x32xf32, #tpu.memory_space<vmem>>, vector<8x32xf32>
      %c0_41 = arith.constant 0 : index
      %c0_42 = arith.constant 0 : index
      %84 = vector.load %arg7[%c0_41, %c0_42] : memref<8x32xf32, #tpu.memory_space<vmem>>, vector<8x32xf32>
      %85 = arith.mulf %82, %82 : vector<8x32xf32>
      %cst_43 = arith.constant dense<0.000000e+00> : vector<8xf32>
      %86 = vector.multi_reduction <add>, %85, %cst_43 [1] : vector<8x32xf32> to vector<8xf32>
      %87 = vector.shape_cast %86 : vector<8xf32> to vector<8x1xf32>
      %cst_44 = arith.constant 1.000000e-16 : f32
      %88 = vector.broadcast %cst_44 : f32 to vector<8x1xf32>
      %89 = arith.maximumf %87, %88 : vector<8x1xf32>
      %90 = math.rsqrt %89 : vector<8x1xf32>
      %91 = arith.mulf %83, %83 : vector<8x32xf32>
      %cst_45 = arith.constant dense<0.000000e+00> : vector<8xf32>
      %92 = vector.multi_reduction <add>, %91, %cst_45 [1] : vector<8x32xf32> to vector<8xf32>
      %93 = vector.shape_cast %92 : vector<8xf32> to vector<8x1xf32>
      %cst_46 = arith.constant 1.000000e-16 : f32
      %94 = vector.broadcast %cst_46 : f32 to vector<8x1xf32>
      %95 = arith.maximumf %93, %94 : vector<8x1xf32>
      %96 = math.rsqrt %95 : vector<8x1xf32>
      %97 = arith.mulf %84, %84 : vector<8x32xf32>
      %cst_47 = arith.constant dense<0.000000e+00> : vector<8xf32>
      %98 = vector.multi_reduction <add>, %97, %cst_47 [1] : vector<8x32xf32> to vector<8xf32>
      %99 = vector.shape_cast %98 : vector<8xf32> to vector<8x1xf32>
      %cst_48 = arith.constant 1.000000e-16 : f32
      %100 = vector.broadcast %cst_48 : f32 to vector<8x1xf32>
      %101 = arith.maximumf %99, %100 : vector<8x1xf32>
      %102 = math.rsqrt %101 : vector<8x1xf32>
      %103 = arith.mulf %82, %83 : vector<8x32xf32>
      %cst_49 = arith.constant dense<0.000000e+00> : vector<8xf32>
      %104 = vector.multi_reduction <add>, %103, %cst_49 [1] : vector<8x32xf32> to vector<8xf32>
      %105 = vector.shape_cast %104 : vector<8xf32> to vector<8x1xf32>
      %106 = arith.mulf %105, %90 : vector<8x1xf32>
      %107 = arith.mulf %106, %96 : vector<8x1xf32>
      %108 = arith.mulf %82, %84 : vector<8x32xf32>
      %cst_50 = arith.constant dense<0.000000e+00> : vector<8xf32>
      %109 = vector.multi_reduction <add>, %108, %cst_50 [1] : vector<8x32xf32> to vector<8xf32>
      %110 = vector.shape_cast %109 : vector<8xf32> to vector<8x1xf32>
      %111 = arith.mulf %110, %90 : vector<8x1xf32>
      %112 = arith.mulf %111, %102 : vector<8x1xf32>
      %cst_51 = arith.constant 3.000000e-01 : f32
      %113 = vector.broadcast %cst_51 : f32 to vector<8x1xf32>
      %114 = arith.addf %113, %112 : vector<8x1xf32>
      %115 = arith.subf %114, %107 : vector<8x1xf32>
      %cst_52 = arith.constant 0.000000e+00 : f32
      %116 = vector.broadcast %cst_52 : f32 to vector<8x1xf32>
      %117 = arith.maximumf %115, %116 : vector<8x1xf32>
      %118 = vector.shape_cast %117 : vector<8x1xf32> to vector<1x8x1xf32>
      %cst_53 = arith.constant dense<0.000000e+00> : vector<1xf32>
      %119 = vector.multi_reduction <add>, %118, %cst_53 [1, 2] : vector<1x8x1xf32> to vector<1xf32>
      %120 = vector.shape_cast %119 : vector<1xf32> to vector<1x1x1xf32>
      %121 = vector.extract %120[0, 0, 0] : f32 from vector<1x1x1xf32>
      %122 = vector.broadcast %121 : f32 to vector<1x1xf32>
      %cst_54 = arith.constant 8.000000e+00 : f32
      %123 = vector.broadcast %cst_54 : f32 to vector<1x1xf32>
      %124 = arith.divf %122, %123 : vector<1x1xf32>
      %c0_55 = arith.constant 0 : index
      %c0_56 = arith.constant 0 : index
      %125 = vector.load %arg12[%c0_55, %c0_56] : memref<1x128xf32, #tpu.memory_space<vmem>>, vector<1x128xf32>
      %126 = vector.shape_cast %125 : vector<1x128xf32> to vector<1x1x128xf32>
      %cst_57 = arith.constant dense<0.000000e+00> : vector<1xf32>
      %127 = vector.multi_reduction <add>, %126, %cst_57 [1, 2] : vector<1x1x128xf32> to vector<1xf32>
      %128 = vector.shape_cast %127 : vector<1xf32> to vector<1x1x1xf32>
      %129 = vector.extract %128[0, 0, 0] : f32 from vector<1x1x1xf32>
      %130 = vector.broadcast %129 : f32 to vector<1x1xf32>
      %c0_58 = arith.constant 0 : index
      %c0_59 = arith.constant 0 : index
      %131 = vector.load %arg13[%c0_58, %c0_59] : memref<1x128xf32, #tpu.memory_space<vmem>>, vector<1x128xf32>
      %132 = vector.shape_cast %131 : vector<1x128xf32> to vector<1x1x128xf32>
      %cst_60 = arith.constant dense<0.000000e+00> : vector<1xf32>
      %133 = vector.multi_reduction <add>, %132, %cst_60 [1, 2] : vector<1x1x128xf32> to vector<1xf32>
      %134 = vector.shape_cast %133 : vector<1xf32> to vector<1x1x1xf32>
      %135 = vector.extract %134[0, 0, 0] : f32 from vector<1x1x1xf32>
      %136 = vector.broadcast %135 : f32 to vector<1x1xf32>
      %137 = tpu.iota {dimensions = array<i32: 0>} : vector<8x128xi32>
      %cst_61 = arith.constant 0.000000e+00 : f32
      %138 = vector.broadcast %cst_61 : f32 to vector<8x128xf32>
      %c0_i32_62 = arith.constant 0 : i32
      %139 = vector.broadcast %c0_i32_62 : i32 to vector<8x128xi32>
      %140 = arith.cmpi eq, %137, %139 : vector<8x128xi32>
      %c1_i32_63 = arith.constant 1 : i32
      %141 = vector.broadcast %c1_i32_63 : i32 to vector<8x128xi32>
      %142 = arith.cmpi eq, %137, %141 : vector<8x128xi32>
      %c2_i32 = arith.constant 2 : i32
      %143 = vector.broadcast %c2_i32 : i32 to vector<8x128xi32>
      %144 = arith.cmpi eq, %137, %143 : vector<8x128xi32>
      %c3_i32 = arith.constant 3 : i32
      %145 = vector.broadcast %c3_i32 : i32 to vector<8x128xi32>
      %146 = arith.cmpi eq, %137, %145 : vector<8x128xi32>
      %147 = vector.shape_cast %136 : vector<1x1xf32> to vector<1x1xf32>
      %148 = vector.broadcast %147 : vector<1x1xf32> to vector<8x128xf32>
      %149 = arith.select %146, %148, %138 : vector<8x128xi1>, vector<8x128xf32>
      %150 = vector.shape_cast %130 : vector<1x1xf32> to vector<1x1xf32>
      %151 = vector.broadcast %150 : vector<1x1xf32> to vector<8x128xf32>
      %152 = arith.select %144, %151, %149 : vector<8x128xi1>, vector<8x128xf32>
      %153 = vector.shape_cast %124 : vector<1x1xf32> to vector<1x1xf32>
      %154 = vector.broadcast %153 : vector<1x1xf32> to vector<8x128xf32>
      %155 = arith.select %142, %154, %152 : vector<8x128xi1>, vector<8x128xf32>
      %156 = vector.shape_cast %81 : vector<1x1xf32> to vector<1x1xf32>
      %157 = vector.broadcast %156 : vector<1x1xf32> to vector<8x128xf32>
      %158 = arith.select %140, %157, %155 : vector<8x128xi1>, vector<8x128xf32>
      %c0_64 = arith.constant 0 : index
      %c0_65 = arith.constant 0 : index
      %159 = vector.load %arg11[%c0_64, %c0_65] : memref<8x128xf32, #tpu.memory_space<vmem>>, vector<8x128xf32>
      tpu.vector_store %arg11[%c0_64, %c0_65], %158 {strides = array<i32>} : memref<8x128xf32, #tpu.memory_space<vmem>>, vector<8x128xf32>,
    } else {
    }
    return
  }
  func.func @transform_0(%arg0: i32, %arg1: i32) -> (i32, i32) {
    %c0_i32 = arith.constant 0 : i32
    %c0_i32_0 = arith.constant 0 : i32
    %c0_i32_1 = arith.constant 0 : i32
    return %c0_i32, %c0_i32_0 : i32, i32
  }
  func.func @transform_1(%arg0: i32, %arg1: i32) -> (i32, i32) {
    %c0_i32 = arith.constant 0 : i32
    %c0_i32_0 = arith.constant 0 : i32
    %c0_i32_1 = arith.constant 0 : i32
    return %c0_i32, %c0_i32_0 : i32, i32
  }
  func.func @transform_2(%arg0: i32, %arg1: i32) -> (i32, i32) {
    %c0_i32 = arith.constant 0 : i32
    %c0_i32_0 = arith.constant 0 : i32
    %c0_i32_1 = arith.constant 0 : i32
    return %c0_i32, %c0_i32_0 : i32, i32
  }
  func.func @transform_3(%arg0: i32, %arg1: i32) -> (i32, i32) {
    %c0_i32 = arith.constant 0 : i32
    %c0_i32_0 = arith.constant 0 : i32
    %c0_i32_1 = arith.constant 0 : i32
    return %c0_i32, %c0_i32_0 : i32, i32
  }
  func.func @transform_4(%arg0: i32, %arg1: i32) -> (i32, i32) {
    %c0_i32 = arith.constant 0 : i32
    %c0_i32_0 = arith.constant 0 : i32
    %c0_i32_1 = arith.constant 0 : i32
    return %c0_i32, %c0_i32_0 : i32, i32
  }
  func.func @transform_5(%arg0: i32, %arg1: i32) -> (i32, i32) {
    %c0_i32 = arith.constant 0 : i32
    %c0_i32_0 = arith.constant 0 : i32
    %c0_i32_1 = arith.constant 0 : i32
    return %c0_i32, %c0_i32_0 : i32, i32
  }
  func.func @transform_6(%arg0: i32, %arg1: i32) -> (i32, i32) {
    %c1_i32 = arith.constant 1 : i32
    %0 = arith.muli %arg0, %c1_i32 : i32
    %1 = arith.addi %0, %arg1 : i32
    %c0_i32 = arith.constant 0 : i32
    %2 = arith.minsi %1, %c0_i32 : i32
    %c0_i32_0 = arith.constant 0 : i32
    %c0_i32_1 = arith.constant 0 : i32
    return %2, %c0_i32_0 : i32, i32
  }
  func.func @transform_7(%arg0: i32, %arg1: i32) -> (i32, i32) {
    %c1_i32 = arith.constant 1 : i32
    %0 = arith.muli %arg0, %c1_i32 : i32
    %1 = arith.addi %0, %arg1 : i32
    %c0_i32 = arith.constant 0 : i32
    %2 = arith.minsi %1, %c0_i32 : i32
    %c0_i32_0 = arith.constant 0 : i32
    %c0_i32_1 = arith.constant 0 : i32
    return %2, %c0_i32_0 : i32, i32
  }
  func.func @transform_8(%arg0: i32, %arg1: i32) -> (i32, i32) {
    %c1_i32 = arith.constant 1 : i32
    %0 = arith.muli %arg0, %c1_i32 : i32
    %1 = arith.addi %0, %arg1 : i32
    %c0_i32 = arith.constant 0 : i32
    %2 = arith.minsi %1, %c0_i32 : i32
    %c0_i32_0 = arith.constant 0 : i32
    %c0_i32_1 = arith.constant 0 : i32
    return %2, %c0_i32_0 : i32, i32
  }
  func.func @transform_9(%arg0: i32, %arg1: i32) -> (i32, i32) {
    %c0_i32 = arith.constant 0 : i32
    %c0_i32_0 = arith.constant 0 : i32
    return %arg0, %c0_i32 : i32, i32
  }
}

</mosaic_0001>

<bundles_post_ra>
// kernel: tpu_custom_call.1
= control target key start
LH: loop header
LB: loop body
LE: loop exit
PB: predicated region body
PF: predicated region fallthrough
CT: control target
= control target key end

     0   :  { %s1692_s0 = inlined_call_operand.hbm [shape: f32[8,8], index: 0, kind: input, shape index: {}]   ;;  %s1693_s1 = inlined_call_operand.vmem [shape: s32[8,1], index: 1, kind: input, shape index: {}]   ;;  %s1694_s2 = inlined_call_operand.vmem [shape: f32[1,8], index: 2, kind: input, shape index: {}]   ;;  %s1695_s3 = inlined_call_operand.hbm [shape: f32[8,32], index: 3, kind: input, shape index: {}]   ;;  %s1696_s4 = inlined_call_operand.hbm [shape: f32[8,32], index: 4, kind: input, shape index: {}]   ;;  %s1697_s5 = inlined_call_operand.hbm [shape: f32[8,32], index: 5, kind: input, shape index: {}]   ;;  %s1698_s6 = inlined_call_operand.vmem [shape: f32[16,128], index: 6, kind: input, shape index: {}]   ;;  %s1699_s7 = inlined_call_operand.hbm [shape: f32[16,128], index: 7, kind: input, shape index: {}]   ;;  %s1700_s8 = inlined_call_operand.vmem [shape: f32[4,128], index: 8, kind: input, shape index: {}]   ;;  %s1701_s9 = inlined_call_operand.hbm [shape: f32[16,128], index: 9, kind: output, shape index: {}]  }
   0x1   :  { %1706 = sst [smem:[#allocation19_spill]] %s1692_s0 }
   0x2   :  { %1707 = sst [smem:[#allocation20_spill]] %s1695_s3 }
   0x3   :  { %1708 = sst [smem:[#allocation21_spill]] %s1696_s4 }
   0x4   :  { %1709 = sst [smem:[#allocation22_spill]] %s1697_s5 }
   0x5   :  { %14 = vsyncpa [#allocation5], 0 }
   0x6   :  { %15 = vsyncpa [#allocation8], 0 }
   0x7   :  { %16 = vsyncpa [#allocation11], 0 }
   0x8   :  { %17 = vsyncpa [#allocation6], 0 }
   0x9   :  { %19 = vsyncpa [#allocation6 + $0x1], 0  ;;  %s1401_s30 = smov 0   ;;  %s1403_s10 = smov 0  }
   0xa   :  { %s1405_s11 = smov 0   ;;  %s1407_s12 = smov 0  }
   0xb   :  { %s1409_s13 = smov 0   ;;  %s1411_s14 = smov 0  }
   0xc   :  { %s1413_s15 = smov 0   ;;  %s1415_s16 = smov 0  }
   0xd LB: > { %s1440_s17 = sadd.s32 4294967295, %s1339_s16   ;;  %s903_s18 = sadd.s32 4294967294, %s1339_s16   ;;  %s1339_s16 = sphi %s1415_s16, %s25_s16   ;;  %s1335_s15 = sphi %s1413_s15, %s1738_s15   ;;  %s1331_s14 = sphi %s1411_s14, %s1737_s14   ;;  %s1327_s13 = sphi %s1409_s13, %s1682_s13   ;;  %s1323_s12 = sphi %s1407_s12, %s1736_s12   ;;  %s1319_s11 = sphi %s1405_s11, %s1735_s11   ;;  %s1315_s10 = sphi %s1403_s10, %s1734_s10   ;;  %s1311_s30 = sphi %s1401_s30, %s1733_s30  }
   0xe   : > { %p221_p0 = scmp.ne.s32.totalorder %s1327_s13, %s1323_s12  ;;  %p1702_p1 = scmp.eq.s32.totalorder %s1440_s17, 0 }
   0xf   : > { %p276_p2 = scmp.ne.s32.totalorder %s1319_s11, %s1315_s10  ;;  %p277_p4 = scmp.eq.s32.totalorder %s1440_s17, 1 }
  0x10   : > { %p1450_p3 = por %p1702_p1, %p221_p0  ;;  %p282_p5 = scmp.ne.s32.totalorder %s1315_s10, %s1311_s30 }
  0x11   : > { %p283_p6 = scmp.eq.s32.totalorder %s903_s18, 1  ;;  %p1457_p7 = por %p277_p4, %p276_p2 }
  0x12   : > { %s1710_s20 = scalar_select %p1450_p3, 1, 0 }
  0x13   : > { %s1711_s21 = scalar_select %p1457_p7, 1, 0 }
  0x14   : > { %p904_p8 = scmp.ge.s32.totalorder %s1339_s16, 1  ;;  %p1462_p9 = por %p283_p6, %p282_p5 }
  0x15   : > { %p290_p10 = scmp.lt.s32.totalorder %s1339_s16, 3  ;;  %s1341_s24 = smov [#allocation4]  }
  0x16   : > { %s1712_s22 = scalar_select %p1462_p9, 1, 0 }
  0x17   : > { %p1467_p11 = pnand %p904_p8, %p290_p10  ;;  %s303_s25 = sshll.u32 %s1341_s24, 4  ;;  %s304_s25 = int_to_ptr.vmem [resolvable:$true] %s303_s25 }
  0x18   : > { %s1342_s26 = smov [#allocation7]   ;;  %s1343_s29 = smov [#allocation9]  }
  0x19   : > { %s1713_s23 = scalar_select %p1467_p11, 1, 0 }
  0x1a   : > { %p970_p13 = pneg %p1467_p11  ;;  %s320_s27 = sshll.u32 %s1342_s26, 4  ;;  %s321_s27 = int_to_ptr.vmem [resolvable:$true] %s320_s27 }
  0x1b   : > { %s331_s12 = sshll.u32 %s1343_s29, 4  ;;  %s1105_s18 = scalar_lea.vmem %s304_s25, 128  ;;  %s1480_s12 = int_to_ptr.vmem [resolvable:$true] %s331_s12 }
  0x1c   : > { %p1476_p0 = pnand %p970_p13, %p1702_p1  ;;  %p1106_p4 = scmp.ne.s32.totalorder %s304_s25, %s1105_s18 }
  0x1d   : > { %p1113_p8 = scmp.lt.s32.totalorder %s304_s25, %s304_s25  ;;  %p1114_p10 = scmp.lt.s32.totalorder %s1105_s18, %s1105_s18 }
  0x1e   : > { %p1096_p2 = pneg %p1476_p0 }
  0x1f   : > { %p1115_p13 = por %p1114_p10, %p1113_p8 }
  0x20   : > { %p1108_p5 = pnand %p1106_p4, %p1096_p2 }
  0x22   : > { %p1109_p6 = pneg %p1108_p5 }
  0x24   : > { %p1116_p12 = pnand %p1115_p13, %p1109_p6 }
  0x26   : > { %1119 = shalt.err (!%p1116_p12)
}
  0x27   : > { %s1715_s0 = sld [smem:[#allocation19_spill]]  ;;  %s1131_s29 = scalar_lea.vmem %s321_s27, 128 }
  0x28   : > { %p1132_p1 = scmp.ne.s32.totalorder %s321_s27, %s1131_s29  ;;  %p1139_p4 = scmp.lt.s32.totalorder %s321_s27, %s321_s27 }
  0x29   : > { %p1140_p5 = scmp.lt.s32.totalorder %s1131_s29, %s1131_s29 }
  0x2a   : > { %p1134_p9 = pnand %p1132_p1, %p1096_p2 }
  0x2b   : > { %p1141_p3 = por %p1140_p5, %p1139_p4 }
  0x2c   : > { %p1135_p7 = pneg %p1134_p9 }
  0x2d   : > { %973 = dma.hbm_to_vmem [thread:$0]  (!%p1476_p0), %s1715_s0, 128, %s304_s25, [#allocation5]  }
  0x2e   : > { %p1142_p11 = pnand %p1141_p3, %p1135_p7 }
  0x30   : > { %1145 = shalt.err (!%p1142_p11)
}
  0x31   : > { %s1716_s3 = sld [smem:[#allocation20_spill]]  ;;  %s1157_s25 = scalar_lea.vmem %s1480_s12, 128 }
  0x32   : > { %p1158_p12 = scmp.ne.s32.totalorder %s1480_s12, %s1157_s25  ;;  %p1165_p6 = scmp.lt.s32.totalorder %s1480_s12, %s1480_s12 }
  0x33   : > { %p1166_p3 = scmp.lt.s32.totalorder %s1157_s25, %s1157_s25 }
  0x34   : > { %p1160_p1 = pnand %p1158_p12, %p1096_p2 }
  0x35   : > { %p1167_p7 = por %p1166_p3, %p1165_p6 }
  0x36   : > { %p1161_p9 = pneg %p1160_p1 }
  0x37   : > { %976 = dma.hbm_to_vmem [thread:$0]  (!%p1476_p0), %s1716_s3, 128, %s321_s27, [#allocation8]  }
  0x38   : > { %p1168_p11 = pnand %p1167_p7, %p1161_p9 }
  0x3a   : > { %1171 = shalt.err (!%p1168_p11)
}
  0x3b   : > { %s1717_s4 = sld [smem:[#allocation21_spill]]  ;;  %s1344_s27 = smov [#allocation10]  }
  0x3c   : > { %s342_s26 = sshll.u32 %s1344_s27, 4  ;;  %s343_s26 = int_to_ptr.vmem [resolvable:$true] %s342_s26 }
  0x3d   : > { %s1183_s29 = scalar_lea.vmem %s343_s26, 128  ;;  %p1191_p4 = scmp.lt.s32.totalorder %s343_s26, %s343_s26 }
  0x3e   : > { %p1184_p8 = scmp.ne.s32.totalorder %s343_s26, %s1183_s29  ;;  %p1192_p5 = scmp.lt.s32.totalorder %s1183_s29, %s1183_s29 }
  0x40   : > { %p1186_p10 = pnand %p1184_p8, %p1096_p2  ;;  %p1193_p12 = por %p1192_p5, %p1191_p4 }
  0x41   : > { %979 = dma.hbm_to_vmem [thread:$0]  (!%p1476_p0), %s1717_s4, 128, %s1480_s12, [#allocation8]  }
  0x42   : > { %p1187_p13 = pneg %p1186_p10 }
  0x44   : > { %p1194_p1 = pnand %p1193_p12, %p1187_p13 }
  0x46   : > { %1197 = shalt.err (!%p1194_p1)
}
  0x47   : > { %s1718_s5 = sld [smem:[#allocation22_spill]]  ;;  %s37_s12 = sadd.s32 1, %s1335_s15 }
  0x48   : > { %p39_p2 = scmp.ge.s32.totalorder %s37_s12, 2  ;;  %p1308_p9 = scmp.ne.s32.totalorder %s1327_s13, 0 }
  0x49   : > { %p216_p6 = scmp.eq.s32.totalorder %s1339_s16, 0  ;;  %s1719_s19 = sadd.s32 1, %s1319_s11 }
  0x4a   : > { %s1740_s12 = smov (%p39_p2, %s37_s12), 0  ;;  %p995_p11 = scmp.lt.s32.totalorder %s1339_s16, 2 }
  0x4b   : > { %s263_s28 = ssub.s32 %s1335_s15, %s1740_s12  ;;  %p217_p3 = por %p1308_p9, %p216_p6 }
  0x4c   : > { %p264_p7 = scmp.eq.s32.totalorder %s263_s28, 0  ;;  %s368_s27 = sand.u32 1, %s1339_s16  }
  0x4d   : > { %982 = dma.hbm_to_vmem [thread:$0]  (!%p1476_p0), %s1718_s5, 128, %s343_s26, [#allocation11]  }
  0x4e   : > { %s1531_s24 = scalar_select %p264_p7, %s1319_s11, %s1719_s19  }
  0x4f   : > { %s1345_s29 = smov [#allocation12]   ;;  %p1535_p8 = pnand %p995_p11, %p217_p3 }
  0x50   : > { %s382_s18 = sshll.u32 %s1345_s29, 4  ;;  %s369_s26 = scalar_lea.sflag [#allocation5], %s368_s27  ;;  %s383_s18 = int_to_ptr.vmem [resolvable:$true] %s382_s18 }
  0x51   : > { %s1198_s4 = scalar_lea.hbm %s1699_s7, 256  ;;  %p1200_p10 = pneg %p1535_p8 }
  0x52   : > { %p1199_p0 = scmp.ne.s32.totalorder %s1699_s7, %s1198_s4  ;;  %p1205_p5 = scmp.lt.s32.totalorder %s1198_s4, %s1198_s4 }
  0x54   : > { %p1201_p13 = pnand %p1200_p10, %p1199_p0 }
  0x56   : > { %p1202_p4 = pneg %p1201_p13 }
  0x58   : > { %p1207_p12 = pnand %p1205_p5, %p1202_p4 }
  0x5a   : > { %1210 = shalt.err (!%p1207_p12)
}
  0x5b   : > { %s1211_s19 = scalar_lea.vmem %s383_s18, 256  ;;  %s1218_s27 = scalar_lea.vmem %s383_s18, 512 }
  0x5c   : > { %p1212_p1 = scmp.ne.s32.totalorder %s383_s18, %s1211_s19  ;;  %p1219_p6 = scmp.lt.s32.totalorder %s383_s18, %s383_s18 }
  0x5d   : > { %p1220_p3 = scmp.lt.s32.totalorder %s1218_s27, %s1211_s19 }
  0x5e   : > { %p1214_p2 = pnand %p1212_p1, %p1200_p10 }
  0x5f   : > { %p1221_p7 = por %p1220_p3, %p1219_p6 }
  0x60   : > { %p1215_p9 = pneg %p1214_p2 }
  0x62   : > { %p1222_p11 = pnand %p1221_p7, %p1215_p9 }
  0x64   : > { %1225 = shalt.err (!%p1222_p11)
}
  0x65   : > { %s1346_s0 = smov 128   ;;  %s1347_s3 = smov 8  }
  0x66   : > { %986 = dma.hbm_to_vmem [thread:$0]  (!%p1535_p8), %s1699_s7, 256, %s383_s18, %s369_s26, %s1346_s0, %s1346_s0, %s1347_s3  }
  0x67   : > { %p1721_p0 = scmp.ne.s32.totalorder %s1713_s23, 0 }
  0x68   : > { %p1722_p10 = scmp.eq.s32.totalorder (!%p1721_p0), %s1440_s17, 0 }
  0x69   : > { %407 = sbr.rel (%p1721_p0) target bundleno = 738 (0x2e2), region = 56 }
  0x6e   : > { %1289 = dma.done.wait (%p1722_p10), [#allocation5], 128   ;;  %p1723_p13 = pmov %p1722_p10 }
  0x6f   : > { %p1724_p4 = pmov %p1722_p10 }
  0x70   : > { %1291 = vsyncadd (%p1723_p13), [#allocation5], 4294967168 }
  0x71   : > { %1293 = dma.done.wait (%p1724_p4), [#allocation8], 256   ;;  %p1725_p5 = pmov %p1724_p4 }
  0x72   : > { %p1726_p12 = pmov %p1724_p4 }
  0x73   : > { %1295 = vsyncadd (%p1725_p5), [#allocation8], 4294967040 }
  0x74   : > { %1297 = dma.done.wait (%p1726_p12), [#allocation11], 128   ;;  %p1727_p8 = pmov %p1724_p4 }
  0x75   : > { %s425_s4 = sand.u32 1, %s1440_s17   ;;  %s427_s23 = sand.u32 1, %s1327_s13  }
  0x76   : > { %1299 = vsyncadd (%p1727_p8), [#allocation11], 4294967168  ;;  %s918_s18 = sshll.u32 %s427_s23, 4  ;;  %s426_s25 = scalar_lea.sflag [#allocation5], %s425_s4 }
  0x77   : > { %s429_s26 = scalar_lea.vmem [#allocation12], %s918_s18  ;;  %p1728_p1 = scmp.ne.s32.totalorder %s1710_s20, 0 }
  0x79   : > { %1301 = dma.done.wait (%p1728_p1), %s426_s25, 256  }
  0x7a   : > { %1303 = vsyncadd (%p1728_p1), %s426_s25, 4294967040  ;;  %p480_p2 = scmp.lt.s32.totalorder %s1331_s14, 0  ;;  %v522_v0 = vlaneseq  ;;  %v1348_v1 = vmov 0.0   ;;  %s927_s17 = sshll.u32 %s1331_s14, 2  ;;  %v514_v7 = vld [vmem:[%s429_s26] sm:$0xff]  ;;  %v515_v8 = vld [vmem:[%s429_s26 + $0x8] sm:$0xff] }
  0x7b   : > { %510 = vst [vmem:[#allocation2] sm:$0x1] %v1348_v1  ;;  %511 = vst [vmem:[#allocation3] sm:$0x1] %v1348_v1  ;;  %s926_s19 = sshll.u32 %s1331_s14, 4  ;;  %v545_v3 = vstv %s927_s17  ;;  %vm549_vm1 = vcmask 1043456  }
  0x7c   : > { %s481_s28 = scalar_select %p480_p2, %s1331_s14, 0  ;;  %v1578_v2 = vshrl.u32 %v522_v0, 7  ;;  %v525_v5 = vstv %s926_s19  ;;  %vm563_vm4 = vcmask 1040384  }
  0x7d   : > { %p596_p6 = scmp.eq.s32.totalorder %s1331_s14, 0  ;;  %s476_s25 = sand.u32 1, %s1315_s10  }
  0x7e   : > { %s920_s20 = sshll.u32 %s481_s28, 1  ;;  %v524_v4 = vadd.s32 8, %v1578_v2  ;;  %s1742_s28 = smov (!%p480_p2, %s481_s28), 0  ;;  %v546_v6 = vadd.s32 %v545_v3, %v1578_v2  ;;  %v526_v9 = vadd.s32 %v525_v5, %v1578_v2  ;;  %vm588_vm5 = vcmp.eq.s32.totalorder %v1578_v2, 3  ;;  %v601_v1 = vld [vmem:[#allocation4] sm:$0xff] (%p596_p6) }
  0x7f   : > { %p483_p9 = scmp.lt.s32.totalorder %s920_s20, 1  ;;  %s925_s27 = sshll.u32 %s1742_s28, 2  ;;  %vm587_vm6 = vcmp.eq.s32.totalorder %v1578_v2, 2  ;;  %vm586_vm7 = vcmp.eq.s32.totalorder %v1578_v2, 1  ;;  %vm585_vm8 = vcmp.eq.s32.totalorder %v1578_v2, 0  ;;  %vm610_vm9 = vcmask (%p596_p6), 64512  }
  0x80   : > { %v527_v10 = vadd.s32 %v525_v5, %v524_v4  ;;  %s501_s29 = scalar_lea.vmem %s1700_s8, %s925_s27  ;;  %vm547_vm0 = vcmp.lt.s32.totalorder %v546_v6, 4  ;;  %vm528_vm2 = vcmp.lt.s32.totalorder %v526_v9, 16  ;;  %s919_s17 = sshll.u32 %s476_s25, 3  ;;  %v611_v3 = vsel (%p596_p6), %vm610_vm9, %v601_v1, -inf  ;;  %v602_v5 = vld [vmem:[%s1693_s1] sm:$0xff] (%p596_p6)  ;;  %v664_v9 = vld [vmem:[#allocation7] sm:$0xff] (%p596_p6) }
  0x81   : > { %s1744_s20 = smov (!%p483_p9, %s920_s20), 1  ;;  %v541_v11 = vld [vmem:[%s501_s29] sm:$0xf]  ;;  %s1610_s19 = scalar_lea.vmem [#allocation13], %s919_s17  ;;  %v1349_v4 = vmov (%p596_p6), 0   ;;  %vm668_vm10 = vcmask (%p596_p6), 261120  }
  0x82   : > { %s921_s0 = sshll.u32 %s1744_s20, 3  ;;  %v543_v14 = vmul.f32 %v541_v11, %v541_v11  ;;  %vm529_vm3 = vcmp.lt.s32.totalorder %v527_v10, 16  ;;  %v542_v32 = vld [vmem:[#allocation3] sm:$0x1]  ;;  %v518_v37 = vld [vmem:[#allocation2] sm:$0x1]  ;;  %1081 = vset.pattern.permute.xlu0 (%p596_p6), %v1349_v4  ;;  %v667_v10 = vmul.f32 (%p596_p6), %v664_v9, %v664_v9 }
  0x83   : > { %s486_s18 = scalar_lea.vmem %s1698_s6, %s921_s0  ;;  %vm639_vm12 = vcmask (%p596_p6), 7168  }
  0x84   : > { %v512_v12 = vld [vmem:[%s486_s18] sm:$0xff]  ;;  %v513_v13 = vld [vmem:[%s486_s18 + $0x8] sm:$0xff]  ;;  %v548_v17 = vsel %vm547_vm0, %v543_v14, 0.0  ;;  %v669_v14 = vsel (%p596_p6), %vm668_vm10, %v667_v10, 0.0 }
  0x85   : > { %v516_v15 = vsub.f32 %v512_v12, %v514_v7  ;;  %v517_v16 = vsub.f32 %v513_v13, %v515_v8  ;;  %v550_v20 = vsel %vm549_vm1, %v548_v17, 0.0  ;;  %v666_v12 = vld [vmem:[#allocation10] sm:$0xff] (%p596_p6)  ;;  %v605_v17 = vand.u32 (%p596_p6), 127, %v522_v0 }
  0x86   : > { %v551_v21 = vrot.slane %v550_v20, 4  ;;  %v692_v0 = vmul.f32 (%p596_p6), %v666_v12, %v664_v9 }
  0x87   : > { %v519_v18 = vmul.f32 %v516_v15, %v516_v15  ;;  %v520_v19 = vmul.f32 %v517_v16, %v517_v16  ;;  %v680_v15 = vmul.f32 (%p596_p6), %v666_v12, %v666_v12  ;;  %v665_v16 = vld [vmem:[#allocation9] sm:$0xff] (%p596_p6) }
  0x88   : > { %v552_v25 = vadd.f32 %v551_v21, %v550_v20  ;;  %v674_v20 = vmul.f32 (%p596_p6), %v665_v16, %v665_v16 }
  0x89   : > { %v530_v22 = vsel %vm528_vm2, %v519_v18, 0.0  ;;  %v531_v23 = vsel %vm529_vm3, %v520_v19, 0.0  ;;  %v681_v19 = vsel (%p596_p6), %vm668_vm10, %v680_v15, 0.0 }
  0x8a   : > { %v532_v24 = vadd.f32 %v531_v23, %v530_v22  ;;  %v553_v27 = vrot.slane %v552_v25, 2  ;;  %v675_v21 = vsel (%p596_p6), %vm668_vm10, %v674_v20, 0.0 }
  0x8c   : > { %v533_v26 = vrot.slane %v532_v24, 4  ;;  %v554_v29 = vadd.f32 %v553_v27, %v552_v25  ;;  %v693_v27 = vsel (%p596_p6), %vm668_vm10, %v692_v0, 0.0 }
  0x8e   : > { %v534_v28 = vadd.f32 %v533_v26, %v532_v24  ;;  %v555_v31 = vrot.slane %v554_v29, 1  ;;  %v929_v24 = vld [vmem:[%s1694_s2] ss:$0 sm:$0xff] (%p596_p6) }
  0x90   : > { %v535_v30 = vrot.slane %v534_v28, 2  ;;  %v556_v34 = vadd.f32 %v555_v31, %v554_v29 }
  0x92   : > { %v536_v33 = vadd.f32 %v535_v30, %v534_v28  ;;  %v557_v36 = vadd.f32 %v556_v34, %v542_v32  ;;  %v686_v28 = vmul.f32 (%p596_p6), %v665_v16, %v664_v9 }
  0x94   : > { %v537_v35 = vrot.slane %v536_v33, 1  ;;  %558 = vst [vmem:[#allocation3] sm:$0x1] %v557_v36  ;;  %v687_v29 = vsel (%p596_p6), %vm668_vm10, %v686_v28, 0.0 }
  0x96   : > { %v538_v38 = vadd.f32 %v537_v35, %v536_v33 }
  0x98   : > { %v539_v39 = vadd.f32 %v538_v38, %v518_v37 }
  0x9a   : > { %540 = vst [vmem:[#allocation2] sm:$0x1] %v539_v39 }
  0x9b   : > { %v574_v41 = vld [vmem:[#allocation3] sm:$0x1] }
  0x9c   : > { %v575_v43 = vsel %vm563_vm4, %v574_v41, 0.0  ;;  %v726_v30 = vld [vmem:[#allocation3] sm:$0x1] (%p596_p6) }
  0x9d   : > { %v727_v31 = vsel (%p596_p6), %vm563_vm4, %v726_v30, 0.0 }
  0xa1   : > { %v562_v40 = vld [vmem:[#allocation2] sm:$0x1] }
  0xa2   : > { %v564_v42 = vsel %vm563_vm4, %v562_v40, 0.0 }
  0xa3   : > { %565 = vadd.xlane.f32.xlu0 %v564_v42 }
  0xa7   : > { %576 = vadd.xlane.f32.xlu0 %v575_v43 }
  0xab   : > { %612 = vmax.xlane.f32.xlu0 (%p596_p6), %v611_v3 }
  0xc1   : > { %607 = vperm.xlu0 (%p596_p6), %1081, %v602_v5  }
  0xe0   : > { %728 = vadd.xlane.f32.xlu0 (%p596_p6), %v727_v31 }
 0x12c   : > { %v566_v44 = vpop.xlane.xlu0 %565 }
 0x12d   : > { %v567_v45 = vrot.slane %v566_v44, 4 }
 0x12f   : > { %v568_v46 = vadd.f32 %v567_v45, %v566_v44 }
 0x130   : > { %v577_v47 = vpop.xlane.xlu0 %576 }
 0x131   : > { %v569_v48 = vrot.slane %v568_v46, 2  ;;  %v578_v49 = vrot.slane %v577_v47, 4 }
 0x133   : > { %v579_v50 = vadd.f32 %v578_v49, %v577_v47  ;;  %v570_v51 = vadd.f32 %v569_v48, %v568_v46 }
 0x134   : > { %v613_v6 = vpop.xlane.xlu0 (%p596_p6), %612 }
 0x135   : > { %v580_v52 = vrot.slane %v579_v50, 2  ;;  %v571_v53 = vrot.slane %v570_v51, 1  ;;  %v614_v7 = vsub.f32 (%p596_p6), %v601_v1, %v613_v6 }
 0x137   : > { %v581_v54 = vadd.f32 %v580_v52, %v579_v50  ;;  %v572_v55 = vadd.f32 %v571_v53, %v570_v51  ;;  %v615_v8 = vmul.f32 (%p596_p6), 1.442695, %v614_v7 }
 0x139   : > { %936 = vpush %v572_v55  ;;  %v582_v56 = vrot.slane %v581_v54, 1  ;;  %1082 = vpow2.f32 (%p596_p6), %v615_v8 }
 0x13b   : > { %v583_v57 = vadd.f32 %v582_v56, %v581_v54 }
 0x13c   : > { %v608_v18 = vpop.permute.xlu0 (%p596_p6), %607 }
 0x13d   : > { %938 = vpush %v583_v57  ;;  %vm609_vm11 = vcmp.eq.s32.totalorder (%p596_p6), %v605_v17, %v608_v18 }
 0x13e   : > { %v623_v22 = vsel (%p596_p6), %vm609_vm11, %v601_v1, 0.0  ;;  %v633_v25 = vsel (%p596_p6), %vm609_vm11, %v929_v24, 0.0 }
 0x13f   : > { %v624_v23 = vsel (%p596_p6), %vm610_vm9, %v623_v22, 0.0  ;;  %v634_v26 = vsel (%p596_p6), %vm610_vm9, %v633_v25, 0.0 }
 0x146   : > { %v1083_v11 = vpop.eup (%p596_p6), %1082 }
 0x147   : > { %v617_v13 = vsel (%p596_p6), %vm610_vm9, %v1083_v11, 0.0 }
 0x148   : > { %618 = vadd.xlane.f32.xlu1 (%p596_p6), %v617_v13 }
 0x14c   : > { %670 = vadd.xlane.f32.xlu1 (%p596_p6), %v669_v14 }
 0x150   : > { %682 = vadd.xlane.f32.xlu1 (%p596_p6), %v681_v19 }
 0x154   : > { %676 = vadd.xlane.f32.xlu1 (%p596_p6), %v675_v21 }
 0x158   : > { %625 = vadd.xlane.f32.xlu1 (%p596_p6), %v624_v23 }
 0x15c   : > { %635 = vadd.xlane.f32.xlu1 (%p596_p6), %v634_v26 }
 0x160   : > { %694 = vadd.xlane.f32.xlu1 (%p596_p6), %v693_v27 }
 0x164   : > { %688 = vadd.xlane.f32.xlu1 (%p596_p6), %v687_v29 }
 0x169   : > { %v729_v8 = vpop.xlane.xlu0 (%p596_p6), %728 }
 0x16a   : > { %s937_s26 = spop %936  ;;  %v730_v12 = vrot.slane (%p596_p6), %v729_v8, 4 }
 0x16b   : > { %v591_v59 = vstv %s937_s26 }
 0x16c   : > { %v731_v16 = vadd.f32 (%p596_p6), %v730_v12, %v729_v8 }
 0x16e   : > { %s939_s28 = spop %938  ;;  %v732_v21 = vrot.slane (%p596_p6), %v731_v16, 2 }
 0x16f   : > { %v589_v58 = vstv %s939_s28 }
 0x170   : > { %v590_v60 = vsel %vm588_vm5, %v589_v58, 0.0  ;;  %600 = sbr.rel (!%p596_p6) target bundleno = 714 (0x2ca), region = 88  ;;  %v733_v26 = vadd.f32 (%p596_p6), %v732_v21, %v731_v16 }
 0x171   : > { %v592_v61 = vsel %vm587_vm6, %v591_v59, %v590_v60  ;;  %v714_v60 = vld [vmem:[#allocation2] sm:$0x1] (%p596_p6) }
 0x172   : > { %v593_v62 = vsel %vm586_vm7, 0.0, %v592_v61  ;;  %v734_v31 = vrot.slane (%p596_p6), %v733_v26, 1 }
 0x173   : > { %v594_v63 = vsel %vm585_vm8, 0.0, %v593_v62  ;;  %v716_v62 = vsel (%p596_p6), %vm563_vm4, %v714_v60, 0.0 }
 0x174   : > { %595 = vst [vmem:[%s1610_s19] sm:$0xff] %v594_v63 }
 0x1d1   : > { %v619_v32 = vpop.xlane.xlu1 %618 }
 0x1d2   : > { %1084 = vlog2.f32 %v619_v32 }
 0x1d5   : > { %v671_v33 = vpop.xlane.xlu1 %670 }
 0x1d6   : > { %v672_v34 = vmax.f32 %v671_v33, 1e-16 }
 0x1d8   : > { %1086 = vrsqrt.f32 %v672_v34  ;;  %v735_v34 = vadd.f32 %v734_v31, %v733_v26 }
 0x1d9   : > { %v683_v35 = vpop.xlane.xlu1 %682 }
 0x1da   : > { %v684_v36 = vmax.f32 %v683_v35, 1e-16 }
 0x1dc   : > { %1088 = vrsqrt.f32 %v684_v36 }
 0x1dd   : > { %v677_v37 = vpop.xlane.xlu1 %676 }
 0x1de   : > { %v678_v38 = vmax.f32 %v677_v37, 1e-16 }
 0x1df   : > { %v1085_v39 = vpop.eup %1084 }
 0x1e0   : > { %v621_v40 = vmul.f32 0.6931472, %v1085_v39  ;;  %1090 = vrsqrt.f32 %v678_v38 }
 0x1e1   : > { %v626_v41 = vpop.xlane.xlu1 %625 }
 0x1e2   : > { %v622_v42 = vadd.f32 %v621_v40, %v613_v6 }
 0x1e4   : > { %v637_v43 = vsub.f32 %v622_v42, %v626_v41 }
 0x1e5   : > { %v636_v44 = vpop.xlane.xlu1 %635  ;;  %v1087_v47 = vpop.eup %1086 }
 0x1e6   : > { %v638_v45 = vmul.f32 %v637_v43, %v636_v44  ;;  %v651_v52 = vsel %vm639_vm12, %v636_v44, 0.0 }
 0x1e8   : > { %v640_v46 = vsel %vm639_vm12, %v638_v45, 0.0 }
 0x1e9   : > { %641 = vadd.xlane.f32.xlu1 %v640_v46  ;;  %v695_v48 = vpop.xlane.xlu1 %694  ;;  %v1089_v50 = vpop.eup %1088 }
 0x1ea   : > { %v696_v49 = vmul.f32 %v1087_v47, %v695_v48 }
 0x1ec   : > { %v697_v51 = vmul.f32 %v1089_v50, %v696_v49 }
 0x1ed   : > { %652 = vadd.xlane.f32.xlu1 %v651_v52  ;;  %v689_v53 = vpop.xlane.xlu1 %688  ;;  %v1091_v55 = vpop.eup %1090 }
 0x1ee   : > { %v690_v54 = vmul.f32 %v1087_v47, %v689_v53  ;;  %v698_v56 = vadd.f32 0.3, %v697_v51 }
 0x1f0   : > { %v691_v57 = vmul.f32 %v1091_v55, %v690_v54 }
 0x1f2   : > { %v699_v58 = vsub.f32 %v698_v56, %v691_v57 }
 0x1f4   : > { %v700_v59 = vmax.f32 %v699_v58, 0.0 }
 0x1f6   : > { %v701_v61 = vsel %vm639_vm12, %v700_v59, 0.0 }
 0x1f7   : > { %702 = vadd.xlane.f32.xlu1 %v701_v61 }
 0x1fb   : > { %717 = vadd.xlane.f32.xlu1 %v716_v62 }
 0x272   : > { %v642_v63 = vpop.xlane.xlu1 %641 }
 0x273   : > { %v643_v1 = vrot.slane %v642_v63, 4 }
 0x275   : > { %v644_v3 = vadd.f32 %v643_v1, %v642_v63 }
 0x276   : > { %v653_v4 = vpop.xlane.xlu1 %652 }
 0x277   : > { %v645_v5 = vrot.slane %v644_v3, 2  ;;  %v654_v6 = vrot.slane %v653_v4, 4 }
 0x279   : > { %v655_v7 = vadd.f32 %v654_v6, %v653_v4  ;;  %v646_v9 = vadd.f32 %v645_v5, %v644_v3 }
 0x27b   : > { %v656_v10 = vrot.slane %v655_v7, 2  ;;  %v647_v11 = vrot.slane %v646_v9, 1 }
 0x27d   : > { %v648_v13 = vadd.f32 %v647_v11, %v646_v9  ;;  %v657_v14 = vadd.f32 %v656_v10, %v655_v7 }
 0x27f   : > { %940 = vpush %v648_v13  ;;  %v658_v15 = vrot.slane %v657_v14, 1 }
 0x280   : > { %v703_v17 = vpop.xlane.xlu1 %702 }
 0x281   : > { %v704_v18 = vrot.slane %v703_v17, 4  ;;  %v659_v19 = vadd.f32 %v658_v15, %v657_v14 }
 0x283   : > { %v705_v20 = vadd.f32 %v704_v18, %v703_v17  ;;  %942 = vpush %v659_v19 }
 0x284   : > { %v718_v22 = vpop.xlane.xlu1 %717 }
 0x285   : > { %v706_v23 = vrot.slane %v705_v20, 2  ;;  %v719_v24 = vrot.slane %v718_v22, 4 }
 0x287   : > { %v720_v25 = vadd.f32 %v719_v24, %v718_v22  ;;  %v707_v0 = vadd.f32 %v706_v23, %v705_v20 }
 0x289   : > { %v721_v27 = vrot.slane %v720_v25, 2  ;;  %v708_v28 = vrot.slane %v707_v0, 1 }
 0x28b   : > { %v722_v29 = vadd.f32 %v721_v27, %v720_v25  ;;  %v709_v30 = vadd.f32 %v708_v28, %v707_v0 }
 0x28d   : > { %944 = vpush %v709_v30  ;;  %v723_v32 = vrot.slane %v722_v29, 1 }
 0x28f   : > { %v724_v33 = vadd.f32 %v723_v32, %v722_v29 }
 0x291   : > { %946 = vpush %v724_v33 }
 0x292   : > { %948 = vpush %v735_v34 }
 0x2b0   : > { %s941_s5 = spop %940 }
 0x2b1   : > { %v650_v38 = vstv %s941_s5 }
 0x2b4   : > { %s943_s29 = spop %942 }
 0x2b5   : > { %v661_v35 = vstv %s943_s29 }
 0x2b6   : > { %1092 = vrcp.f32 %v661_v35 }
 0x2be   : > { %s945_s4 = spop %944 }
 0x2bf   : > { %v711_v36 = vstv %s945_s4 }
 0x2c0   : > { %v713_v42 = vmul.f32 0.125, %v711_v36 }
 0x2c2   : > { %s947_s23 = spop %946 }
 0x2c3   : > { %v1093_v37 = vpop.eup %1092  ;;  %v743_v39 = vstv %s947_s23  ;;  %s949_s18 = spop %948 }
 0x2c4   : > { %v663_v40 = vmul.f32 %v1093_v37, %v650_v38  ;;  %v741_v41 = vstv %s949_s18 }
 0x2c5   : > { %v742_v43 = vsel %vm588_vm5, %v741_v41, 0.0 }
 0x2c6   : > { %v744_v44 = vsel %vm587_vm6, %v743_v39, %v742_v43 }
 0x2c7   : > { %v745_v45 = vsel %vm586_vm7, %v713_v42, %v744_v44 }
 0x2c8   : > { %v746_v46 = vsel %vm585_vm8, %v663_v40, %v745_v45 }
 0x2c9   : > { %747 = vst [vmem:[%s1610_s19] sm:$0xff] %v746_v46 }
 0x2ca PF: > { %s931_s26 = sshll.u32 %s1331_s14, 7  ;;  %s762_s27 = sshll.u32 %s1610_s19, 4  ;;  %s763_s27 = int_to_ptr.vmem [resolvable:$true] %s762_s27 }
 0x2cb   : > { %s760_s20 = scalar_lea.hbm %s1701_s9, %s931_s26  ;;  %s749_s0 = scalar_lea.sflag [#allocation6], %s476_s25 }
 0x2cc   : > { %s1226_s3 = scalar_lea.vmem %s763_s27, 128  ;;  %p1729_p7 = scmp.ne.s32.totalorder %s1711_s21, 0 }
 0x2cd   : > { %p1227_p3 = scmp.ne.s32.totalorder %s763_s27, %s1226_s3  ;;  %s1350_s5 = smov [#allocation13]  }
 0x2ce   : > { %s1230_s29 = sshll.u32 %s1350_s5, 4  ;;  %s1231_s29 = int_to_ptr.vmem [resolvable:$false] %s1230_s29 }
 0x2cf   : > { %p1228_p11 = pnand %p1227_p3, %p1729_p7  ;;  %s1232_s4 = scalar_lea.vmem %s1231_s29, 256 }
 0x2d0   : > { %p1233_p10 = scmp.lt.s32.totalorder %s763_s27, %s1231_s29  ;;  %p1234_p13 = scmp.lt.s32.totalorder %s1232_s4, %s1226_s3 }
 0x2d1   : > { %p1229_p0 = pneg %p1228_p11 }
 0x2d2   : > { %p1235_p4 = por %p1234_p13, %p1233_p10 }
 0x2d4   : > { %p1236_p5 = pnand %p1235_p4, %p1229_p0 }
 0x2d6   : > { %1239 = shalt.err (!%p1236_p5)
}
 0x2d7   : > { %s1240_s14 = scalar_lea.hbm %s760_s20, 128  ;;  %s1244_s23 = scalar_lea.hbm %s1701_s9, 256 }
 0x2d8   : > { %p1241_p12 = scmp.ne.s32.totalorder %s760_s20, %s1240_s14  ;;  %p1245_p2 = scmp.lt.s32.totalorder %s760_s20, %s1701_s9 }
 0x2d9   : > { %p1246_p9 = scmp.lt.s32.totalorder %s1244_s23, %s1240_s14 }
 0x2da   : > { %p1242_p8 = pnand %p1241_p12, %p1729_p7 }
 0x2db   : > { %p1247_p6 = por %p1246_p9, %p1245_p2 }
 0x2dc   : > { %p1243_p1 = pneg %p1242_p8 }
 0x2de   : > { %p1248_p3 = pnand %p1247_p6, %p1243_p1 }
 0x2e0   : > { %1251 = shalt.err (!%p1248_p3)
}
 0x2e1   : > { %968 = dma.vmem_to_hbm [thread:$0]  (%p1729_p7), %s763_s27, 128, %s760_s20, %s749_s0  }
 0x2e2 PF: > { %s774_s17 = sand.u32 1, %s1311_s30   ;;  %p1730_p11 = scmp.ne.s32.totalorder %s1712_s22, 0 }
 0x2e3   : > { %p1731_p0 = scmp.ge.s32.totalorder %s1339_s16, 2  ;;  %s775_s28 = scalar_lea.sflag [#allocation6], %s774_s17 }
 0x2e5   : > { %p988_p10 = pnand %p1731_p0, %p1730_p11 }
 0x2e7   : > { %p989_p13 = pneg %p988_p10 }
 0x2e9   : > { %1305 = dma.done.wait (%p989_p13), %s775_s28, 128  }
 0x2ea   : > { %1307 = vsyncadd (%p989_p13), %s775_s28, 4294967168  ;;  %s25_s16 = sadd.s32 1, %s1339_s16   ;;  %s1732_s21 = smov %s1740_s12 }
 0x2eb   : > { %p22_p4 = scmp.ge.s32.totalorder %s25_s16, 4   ;;  %s1733_s30 = smov %s1315_s10 }
 0x2ec   : > { %s1734_s10 = smov %s1319_s11  ;;  %s1735_s11 = smov %s1531_s24 }
 0x2ed   : > { %s1736_s12 = smov %s1327_s13  ;;  %s1682_s13 = smov 0  }
 0x2ee   : > { %s1737_s14 = smov %s1335_s15  ;;  %s1738_s15 = smov %s1732_s21 }
 0x2ef   :  { %24 = sbr.rel (!%p22_p4) target bundleno = 13 (0xd), region = 134 }
 0x2f4   :  { %780 = vsyncpa [#allocation5], 1 }
 0x2f5   :  { %782 = vsyncpa [#allocation5 + $0x1], 1 }
 0x2f6   :  { %783 = vsyncpa [#allocation8], 1 }
 0x2f7   :  { %784 = vsyncpa [#allocation11], 1 }
 0x2f8   :  { %785 = vsyncpa [#allocation6], 1 }
 0x2f9   :  { %787 = vsyncpa [#allocation6 + $0x1], 1 }

</bundles_post_ra>
